<compile_context>
chip_gen: v7x
topology: tpu7x:2x2x1
jax: 0.10.0
libtpu: 0.0.40
codegen_flags: <defaults>
</compile_context>

<pallas_src>
import functools

import numpy as np
import jax
import jax.numpy as jnp
from jax.experimental import pallas as pl
from jax.experimental.pallas import tpu as pltpu

IN = 2        # fc1 input width
HIDDEN = 10   # fc1 output width


def mlp_kernel(p_ref, x_ref, out_ref, *, npos):
    # p_ref  : SMEM (31,) f32 -- [scaled fc1.weight (10,2) row-major | scaled fc1.bias (10,) | fc2.bias]
    #          hidden units are permuted so units 0..npos-1 have fc2 weight >= 0 and the rest < 0,
    #          with |w2_j| already folded into the fc1 row/bias (relu(|a|*z) == |a|*relu(z)).
    # x_ref  : VMEM (2, nt, 128) -- features on the leading axis, batch on (sublane, lane)
    # out_ref: VMEM (nt, 128)
    x0 = x_ref[0]                        # (nt, 128): input feature 0 across the batch tile
    x1 = x_ref[1]                        # (nt, 128): input feature 1
    acc_p = None                         # sum of relu terms with positive fc2 weight
    acc_n = None                         # sum of relu terms with negative fc2 weight
    for j in range(HIDDEN):              # fully unrolled: 10 hidden units, VPU mul/add/max only
        z = x0 * p_ref[2 * j] + x1 * p_ref[2 * j + 1] + p_ref[2 * HIDDEN + j]
        h = jnp.maximum(z, 0.0)          # ReLU on the VPU
        if j < npos:                     # static routing -> no per-unit w2 multiply (review #5)
            acc_p = h if acc_p is None else acc_p + h
        else:
            acc_n = h if acc_n is None else acc_n + h
    b2 = p_ref[3 * HIDDEN]               # fc2.bias, added exactly once at the end (review #7)
    if acc_p is None:
        out = b2 - acc_n
    elif acc_n is None:
        out = acc_p + b2
    else:
        out = (acc_p - acc_n) + b2
    out_ref[...] = out


def pack_params(w1, b1, w2, b2):
    """Pack PyTorch-layout params once at init (outside jit; needs concrete values).

    Folds fc2 into fc1: hidden unit j is rescaled by |w2_j| and units are permuted so that all
    w2_j >= 0 units come first.  Returns (packed (31,) f32 array, npos) where npos is a static
    Python int telling the kernel how many leading units accumulate with a + sign.
    Re-pack (which re-specializes the kernel) if the sign pattern of fc2.weight changes.
    """
    w1 = np.asarray(w1, np.float32).reshape(HIDDEN, IN)
    b1 = np.asarray(b1, np.float32).reshape(HIDDEN)
    w2 = np.asarray(w2, np.float32).reshape(HIDDEN)
    b2 = np.asarray(b2, np.float32).reshape(1)
    order = np.argsort(w2 < 0, kind="stable")       # w2 >= 0 units first, stable within groups
    npos = int(np.sum(w2 >= 0))
    scale = np.abs(w2)[order]
    packed = np.concatenate([
        (w1[order] * scale[:, None]).reshape(-1),   # 20: |w2_j| * fc1.weight[j, :]
        b1[order] * scale,                          # 10: |w2_j| * fc1.bias[j]
        b2,                                         # 1 : fc2.bias
    ]).astype(np.float32)
    return jnp.asarray(packed), npos


def mlp_forward_tiled(xt, params, npos, *, grid, nt):
    """Zero-plumbing fast path (recommended entry for fused consumers).

    xt     : (2, grid*nt, 128) f32 feature-major; batch row b lives at (sublane b//128, lane b%128).
    returns: (grid*nt, 128) f32 lane-tiled outputs (same batch mapping), unmasked full-lane stores.
    """
    n_rows = xt.shape[1]
    assert n_rows == grid * nt
    bp = n_rows * 128
    return pl.pallas_call(
        functools.partial(mlp_kernel, npos=npos),
        out_shape=jax.ShapeDtypeStruct((n_rows, 128), jnp.float32),
        grid_spec=pltpu.PrefetchScalarGridSpec(
            num_scalar_prefetch=1,                              # params -> SMEM once per call
            grid=(grid,),                                       # 1-D grid over batch tiles
            in_specs=[pl.BlockSpec((2, nt, 128), lambda i, p: (0, i, 0))],
            out_specs=pl.BlockSpec((nt, 128), lambda i, p: (i, 0)),
        ),
        compiler_params=pltpu.CompilerParams(
            dimension_semantics=("parallel",)),                 # v7x: shard batch tiles over 2 TCs
        cost_estimate=pl.CostEstimate(                          # scheduling hint (review #9)
            flops=61 * bp, transcendentals=0, bytes_accessed=12 * bp),
    )(params, xt)


def _round_up(a, m):
    return ((a + m - 1) // m) * m


@functools.partial(jax.jit, static_argnames=("npos", "tb_cap"))
def dnn_forward(x, params, npos, *, tb_cap=32768):
    """PyTorch-compatible forward: x (B, 2) f32 -> (B, 1) f32."""
    B = x.shape[0]
    bp128 = _round_up(max(B, 1), 128)

    # Batch-tile selection (reviews #3/#4): as large as possible (few grid steps / little per-step
    # overhead) but split into >= 2 blocks whenever there is more than one 1024-row slab, so both
    # v7x TensorCores get work.  nt is a multiple of 8 (or the full single-block extent), so the
    # (8,128) block-shape rule holds for every size.
    if bp128 <= 1024:
        tb = bp128                                              # single block
    else:
        tb = min(tb_cap, _round_up(pl.cdiv(bp128, 2), 1024))    # grid >= 2, nt % 8 == 0
    grid = pl.cdiv(bp128, tb)
    Bp = grid * tb
    nt = tb // 128

    # Input plumbing (review #1): one fused pad+transpose producing the feature-major lane-tiled
    # view.  Callers that already hold feature-major data should call mlp_forward_tiled directly
    # and skip this relayout entirely.
    xt = jnp.pad(x.astype(jnp.float32).T, ((0, 0), (0, Bp - B))).reshape(2, Bp // 128, 128)

    out_tiled = mlp_forward_tiled(xt, params, npos, grid=grid, nt=nt)

    # Output plumbing (review #2): slab -> flat is a layout-preserving (free) reshape; only the
    # final (B, 1) view -- required by the nn.Module signature -- pays a relayout.
    return out_tiled.reshape(Bp)[:B].reshape(B, 1)


def init_params(key):
    """Deterministic init matching PyTorch nn.Linear shapes: W:(out,in), b:(out,)."""
    k1, k2, k3, k4 = jax.random.split(key, 4)
    w1 = jax.random.uniform(k1, (HIDDEN, IN), jnp.float32, -0.5, 0.5)
    b1 = jax.random.uniform(k2, (HIDDEN,), jnp.float32, -0.5, 0.5)
    w2 = jax.random.uniform(k3, (1, HIDDEN), jnp.float32, -0.3, 0.3)
    b2 = jax.random.uniform(k4, (1,), jnp.float32, -0.3, 0.3)
    return w1, b1, w2, b2


def reference(x, w1, b1, w2, b2):
    h = jnp.maximum(x @ w1.T + b1, 0.0)
    return h @ w2.T + b2


if __name__ == "__main__":
    key = jax.random.PRNGKey(0)
    kx, kp = jax.random.split(key)
    w1, b1, w2, b2 = init_params(kp)
    params, npos = pack_params(w1, b1, w2, b2)     # packed once, outside the per-call path

    # Small-batch check (single tile, batch padded to 128 lanes).
    x_small = jax.random.normal(kx, (8, IN), jnp.float32)
    out_small = jax.block_until_ready(dnn_forward(x_small, params, npos=npos))
    assert out_small.shape == (8, 1)
    assert jnp.allclose(out_small, reference(x_small, w1, b1, w2, b2), atol=1e-5, rtol=1e-5)

    # Multi-tile check (grid length 2 -> exercises the "parallel" 2-TensorCore path on v7x).
    x_big = jax.random.normal(kx, (2048, IN), jnp.float32)
    out_big = jax.block_until_ready(dnn_forward(x_big, params, npos=npos))
    assert out_big.shape == (2048, 1)
    assert jnp.allclose(out_big, reference(x_big, w1, b1, w2, b2), atol=1e-5, rtol=1e-5)

    print("KERNEL_OK")
</pallas_src>

<mosaic_0001>
module attributes {stable_mosaic.version = 11 : i64} {
  func.func @mlp_kernel(%arg0: i32, %arg1: memref<31xf32, #tpu.memory_space<smem>>, %arg2: memref<2x1x128xf32, #tpu.memory_space<vmem>>, %arg3: memref<1x128xf32, #tpu.memory_space<vmem>>) attributes {dimension_semantics = [#tpu.dimension_semantics<parallel>], iteration_bounds = array<i64: 1>, scalar_prefetch = 1 : i64, scratch_operands = 0 : i64, tpu.core_type = #tpu.core_type<tc>, window_params = [{transform_indices = @transform_0, window_bounds = array<i64: 2, 1, 128>}, {transform_indices = @transform_1, window_bounds = array<i64: 1, 128>}]} {
    %c0 = arith.constant 0 : index
    %c0_0 = arith.constant 0 : index
    %c0_1 = arith.constant 0 : index
    %0 = vector.load %arg2[%c0, %c0_0, %c0_1] : memref<2x1x128xf32, #tpu.memory_space<vmem>>, vector<1x1x128xf32>
    %1 = vector.shape_cast %0 : vector<1x1x128xf32> to vector<1x128xf32>
    %c1 = arith.constant 1 : index
    %c0_2 = arith.constant 0 : index
    %c0_3 = arith.constant 0 : index
    %2 = vector.load %arg2[%c1, %c0_2, %c0_3] : memref<2x1x128xf32, #tpu.memory_space<vmem>>, vector<1x1x128xf32>
    %3 = vector.shape_cast %2 : vector<1x1x128xf32> to vector<1x128xf32>
    %c0_4 = arith.constant 0 : index
    %4 = memref.load %arg1[%c0_4] : memref<31xf32, #tpu.memory_space<smem>>
    %5 = vector.broadcast %4 : f32 to vector<1x128xf32>
    %6 = arith.mulf %1, %5 : vector<1x128xf32>
    %c1_5 = arith.constant 1 : index
    %7 = memref.load %arg1[%c1_5] : memref<31xf32, #tpu.memory_space<smem>>
    %8 = vector.broadcast %7 : f32 to vector<1x128xf32>
    %9 = arith.mulf %3, %8 : vector<1x128xf32>
    %10 = arith.addf %6, %9 : vector<1x128xf32>
    %c20 = arith.constant 20 : index
    %11 = memref.load %arg1[%c20] : memref<31xf32, #tpu.memory_space<smem>>
    %12 = vector.broadcast %11 : f32 to vector<1x128xf32>
    %13 = arith.addf %10, %12 : vector<1x128xf32>
    %cst = arith.constant 0.000000e+00 : f32
    %14 = vector.broadcast %cst : f32 to vector<1x128xf32>
    %15 = arith.maximumf %13, %14 : vector<1x128xf32>
    %c2 = arith.constant 2 : index
    %16 = memref.load %arg1[%c2] : memref<31xf32, #tpu.memory_space<smem>>
    %17 = vector.broadcast %16 : f32 to vector<1x128xf32>
    %18 = arith.mulf %1, %17 : vector<1x128xf32>
    %c3 = arith.constant 3 : index
    %19 = memref.load %arg1[%c3] : memref<31xf32, #tpu.memory_space<smem>>
    %20 = vector.broadcast %19 : f32 to vector<1x128xf32>
    %21 = arith.mulf %3, %20 : vector<1x128xf32>
    %22 = arith.addf %18, %21 : vector<1x128xf32>
    %c21 = arith.constant 21 : index
    %23 = memref.load %arg1[%c21] : memref<31xf32, #tpu.memory_space<smem>>
    %24 = vector.broadcast %23 : f32 to vector<1x128xf32>
    %25 = arith.addf %22, %24 : vector<1x128xf32>
    %cst_6 = arith.constant 0.000000e+00 : f32
    %26 = vector.broadcast %cst_6 : f32 to vector<1x128xf32>
    %27 = arith.maximumf %25, %26 : vector<1x128xf32>
    %28 = arith.addf %15, %27 : vector<1x128xf32>
    %c4 = arith.constant 4 : index
    %29 = memref.load %arg1[%c4] : memref<31xf32, #tpu.memory_space<smem>>
    %30 = vector.broadcast %29 : f32 to vector<1x128xf32>
    %31 = arith.mulf %1, %30 : vector<1x128xf32>
    %c5 = arith.constant 5 : index
    %32 = memref.load %arg1[%c5] : memref<31xf32, #tpu.memory_space<smem>>
    %33 = vector.broadcast %32 : f32 to vector<1x128xf32>
    %34 = arith.mulf %3, %33 : vector<1x128xf32>
    %35 = arith.addf %31, %34 : vector<1x128xf32>
    %c22 = arith.constant 22 : index
    %36 = memref.load %arg1[%c22] : memref<31xf32, #tpu.memory_space<smem>>
    %37 = vector.broadcast %36 : f32 to vector<1x128xf32>
    %38 = arith.addf %35, %37 : vector<1x128xf32>
    %cst_7 = arith.constant 0.000000e+00 : f32
    %39 = vector.broadcast %cst_7 : f32 to vector<1x128xf32>
    %40 = arith.maximumf %38, %39 : vector<1x128xf32>
    %41 = arith.addf %28, %40 : vector<1x128xf32>
    %c6 = arith.constant 6 : index
    %42 = memref.load %arg1[%c6] : memref<31xf32, #tpu.memory_space<smem>>
    %43 = vector.broadcast %42 : f32 to vector<1x128xf32>
    %44 = arith.mulf %1, %43 : vector<1x128xf32>
    %c7 = arith.constant 7 : index
    %45 = memref.load %arg1[%c7] : memref<31xf32, #tpu.memory_space<smem>>
    %46 = vector.broadcast %45 : f32 to vector<1x128xf32>
    %47 = arith.mulf %3, %46 : vector<1x128xf32>
    %48 = arith.addf %44, %47 : vector<1x128xf32>
    %c23 = arith.constant 23 : index
    %49 = memref.load %arg1[%c23] : memref<31xf32, #tpu.memory_space<smem>>
    %50 = vector.broadcast %49 : f32 to vector<1x128xf32>
    %51 = arith.addf %48, %50 : vector<1x128xf32>
    %cst_8 = arith.constant 0.000000e+00 : f32
    %52 = vector.broadcast %cst_8 : f32 to vector<1x128xf32>
    %53 = arith.maximumf %51, %52 : vector<1x128xf32>
    %54 = arith.addf %41, %53 : vector<1x128xf32>
    %c8 = arith.constant 8 : index
    %55 = memref.load %arg1[%c8] : memref<31xf32, #tpu.memory_space<smem>>
    %56 = vector.broadcast %55 : f32 to vector<1x128xf32>
    %57 = arith.mulf %1, %56 : vector<1x128xf32>
    %c9 = arith.constant 9 : index
    %58 = memref.load %arg1[%c9] : memref<31xf32, #tpu.memory_space<smem>>
    %59 = vector.broadcast %58 : f32 to vector<1x128xf32>
    %60 = arith.mulf %3, %59 : vector<1x128xf32>
    %61 = arith.addf %57, %60 : vector<1x128xf32>
    %c24 = arith.constant 24 : index
    %62 = memref.load %arg1[%c24] : memref<31xf32, #tpu.memory_space<smem>>
    %63 = vector.broadcast %62 : f32 to vector<1x128xf32>
    %64 = arith.addf %61, %63 : vector<1x128xf32>
    %cst_9 = arith.constant 0.000000e+00 : f32
    %65 = vector.broadcast %cst_9 : f32 to vector<1x128xf32>
    %66 = arith.maximumf %64, %65 : vector<1x128xf32>
    %c10 = arith.constant 10 : index
    %67 = memref.load %arg1[%c10] : memref<31xf32, #tpu.memory_space<smem>>
    %68 = vector.broadcast %67 : f32 to vector<1x128xf32>
    %69 = arith.mulf %1, %68 : vector<1x128xf32>
    %c11 = arith.constant 11 : index
    %70 = memref.load %arg1[%c11] : memref<31xf32, #tpu.memory_space<smem>>
    %71 = vector.broadcast %70 : f32 to vector<1x128xf32>
    %72 = arith.mulf %3, %71 : vector<1x128xf32>
    %73 = arith.addf %69, %72 : vector<1x128xf32>
    %c25 = arith.constant 25 : index
    %74 = memref.load %arg1[%c25] : memref<31xf32, #tpu.memory_space<smem>>
    %75 = vector.broadcast %74 : f32 to vector<1x128xf32>
    %76 = arith.addf %73, %75 : vector<1x128xf32>
    %cst_10 = arith.constant 0.000000e+00 : f32
    %77 = vector.broadcast %cst_10 : f32 to vector<1x128xf32>
    %78 = arith.maximumf %76, %77 : vector<1x128xf32>
    %79 = arith.addf %66, %78 : vector<1x128xf32>
    %c12 = arith.constant 12 : index
    %80 = memref.load %arg1[%c12] : memref<31xf32, #tpu.memory_space<smem>>
    %81 = vector.broadcast %80 : f32 to vector<1x128xf32>
    %82 = arith.mulf %1, %81 : vector<1x128xf32>
    %c13 = arith.constant 13 : index
    %83 = memref.load %arg1[%c13] : memref<31xf32, #tpu.memory_space<smem>>
    %84 = vector.broadcast %83 : f32 to vector<1x128xf32>
    %85 = arith.mulf %3, %84 : vector<1x128xf32>
    %86 = arith.addf %82, %85 : vector<1x128xf32>
    %c26 = arith.constant 26 : index
    %87 = memref.load %arg1[%c26] : memref<31xf32, #tpu.memory_space<smem>>
    %88 = vector.broadcast %87 : f32 to vector<1x128xf32>
    %89 = arith.addf %86, %88 : vector<1x128xf32>
    %cst_11 = arith.constant 0.000000e+00 : f32
    %90 = vector.broadcast %cst_11 : f32 to vector<1x128xf32>
    %91 = arith.maximumf %89, %90 : vector<1x128xf32>
    %92 = arith.addf %79, %91 : vector<1x128xf32>
    %c14 = arith.constant 14 : index
    %93 = memref.load %arg1[%c14] : memref<31xf32, #tpu.memory_space<smem>>
    %94 = vector.broadcast %93 : f32 to vector<1x128xf32>
    %95 = arith.mulf %1, %94 : vector<1x128xf32>
    %c15 = arith.constant 15 : index
    %96 = memref.load %arg1[%c15] : memref<31xf32, #tpu.memory_space<smem>>
    %97 = vector.broadcast %96 : f32 to vector<1x128xf32>
    %98 = arith.mulf %3, %97 : vector<1x128xf32>
    %99 = arith.addf %95, %98 : vector<1x128xf32>
    %c27 = arith.constant 27 : index
    %100 = memref.load %arg1[%c27] : memref<31xf32, #tpu.memory_space<smem>>
    %101 = vector.broadcast %100 : f32 to vector<1x128xf32>
    %102 = arith.addf %99, %101 : vector<1x128xf32>
    %cst_12 = arith.constant 0.000000e+00 : f32
    %103 = vector.broadcast %cst_12 : f32 to vector<1x128xf32>
    %104 = arith.maximumf %102, %103 : vector<1x128xf32>
    %105 = arith.addf %92, %104 : vector<1x128xf32>
    %c16 = arith.constant 16 : index
    %106 = memref.load %arg1[%c16] : memref<31xf32, #tpu.memory_space<smem>>
    %107 = vector.broadcast %106 : f32 to vector<1x128xf32>
    %108 = arith.mulf %1, %107 : vector<1x128xf32>
    %c17 = arith.constant 17 : index
    %109 = memref.load %arg1[%c17] : memref<31xf32, #tpu.memory_space<smem>>
    %110 = vector.broadcast %109 : f32 to vector<1x128xf32>
    %111 = arith.mulf %3, %110 : vector<1x128xf32>
    %112 = arith.addf %108, %111 : vector<1x128xf32>
    %c28 = arith.constant 28 : index
    %113 = memref.load %arg1[%c28] : memref<31xf32, #tpu.memory_space<smem>>
    %114 = vector.broadcast %113 : f32 to vector<1x128xf32>
    %115 = arith.addf %112, %114 : vector<1x128xf32>
    %cst_13 = arith.constant 0.000000e+00 : f32
    %116 = vector.broadcast %cst_13 : f32 to vector<1x128xf32>
    %117 = arith.maximumf %115, %116 : vector<1x128xf32>
    %118 = arith.addf %105, %117 : vector<1x128xf32>
    %c18 = arith.constant 18 : index
    %119 = memref.load %arg1[%c18] : memref<31xf32, #tpu.memory_space<smem>>
    %120 = vector.broadcast %119 : f32 to vector<1x128xf32>
    %121 = arith.mulf %1, %120 : vector<1x128xf32>
    %c19 = arith.constant 19 : index
    %122 = memref.load %arg1[%c19] : memref<31xf32, #tpu.memory_space<smem>>
    %123 = vector.broadcast %122 : f32 to vector<1x128xf32>
    %124 = arith.mulf %3, %123 : vector<1x128xf32>
    %125 = arith.addf %121, %124 : vector<1x128xf32>
    %c29 = arith.constant 29 : index
    %126 = memref.load %arg1[%c29] : memref<31xf32, #tpu.memory_space<smem>>
    %127 = vector.broadcast %126 : f32 to vector<1x128xf32>
    %128 = arith.addf %125, %127 : vector<1x128xf32>
    %cst_14 = arith.constant 0.000000e+00 : f32
    %129 = vector.broadcast %cst_14 : f32 to vector<1x128xf32>
    %130 = arith.maximumf %128, %129 : vector<1x128xf32>
    %131 = arith.addf %118, %130 : vector<1x128xf32>
    %c30 = arith.constant 30 : index
    %132 = memref.load %arg1[%c30] : memref<31xf32, #tpu.memory_space<smem>>
    %133 = arith.subf %54, %131 : vector<1x128xf32>
    %134 = vector.broadcast %132 : f32 to vector<1x128xf32>
    %135 = arith.addf %133, %134 : vector<1x128xf32>
    %c0_15 = arith.constant 0 : index
    %c0_16 = arith.constant 0 : index
    %136 = vector.load %arg3[%c0_15, %c0_16] : memref<1x128xf32, #tpu.memory_space<vmem>>, vector<1x128xf32>
    tpu.vector_store %arg3[%c0_15, %c0_16], %135 {strides = array<i32>} : memref<1x128xf32, #tpu.memory_space<vmem>>, vector<1x128xf32>,
    return
  }
  func.func @transform_0(%arg0: i32, %arg1: memref<31xf32, #tpu.memory_space<smem>>) -> (i32, i32, i32) {
    %c0_i32 = arith.constant 0 : i32
    %c0_i32_0 = arith.constant 0 : i32
    %c0_i32_1 = arith.constant 0 : i32
    return %c0_i32, %arg0, %c0_i32_0 : i32, i32, i32
  }
  func.func @transform_1(%arg0: i32, %arg1: memref<31xf32, #tpu.memory_space<smem>>) -> (i32, i32) {
    %c0_i32 = arith.constant 0 : i32
    %c0_i32_0 = arith.constant 0 : i32
    return %arg0, %c0_i32 : i32, i32
  }
}

</mosaic_0001>

<bundles_post_ra>
// kernel: dnn_forward.1
= control target key start
LH: loop header
LB: loop body
LE: loop exit
PB: predicated region body
PF: predicated region fallthrough
CT: control target
= control target key end

     0   :  { %s315_s0 = inlined_call_operand.vmem [shape: f32[31], index: 0, kind: input, shape index: {}]   ;;  %s316_s1 = inlined_call_operand.vmem [shape: f32[2,1,128], index: 1, kind: input, shape index: {}]   ;;  %s317_s2 = inlined_call_operand.vmem [shape: f32[1,128], index: 2, kind: output, shape index: {}]  }
   0x1   :  { %s7_s11 = sshll.u32 %s315_s0, 4  ;;  %s8_s11 = int_to_ptr.vmem [resolvable:$true] %s7_s11 }
   0x2   :  { %s177_s12 = scalar_lea.vmem %s8_s11, 16  ;;  %p182_p1 = scmp.lt.s32.totalorder %s8_s11, %s8_s11 }
   0x3   :  { %p178_p0 = scmp.ne.s32.totalorder %s8_s11, %s177_s12  ;;  %p183_p2 = scmp.lt.s32.totalorder %s177_s12, %s177_s12 }
   0x5   :  { %p184_p3 = por %p183_p2, %p182_p1 }
   0x7   :  { %p185_p4 = pnand %p184_p3, %p178_p0 }
   0x9   :  { %188 = shalt.err (!%p185_p4)  }
   0xa   :  { %s191_s13 = smov [#allocation3]  }
   0xb   :  { %10 = dma.vmem_to_smem %s8_s11, 16, %s191_s13, [#allocation2] }
   0xc   :  { %189 = dma.done.wait [#allocation2], 16 }
   0xd   :  { %190 = vsyncadd [#allocation2], 4294967280 }
   0xe   :  { %12 = sfence }
   0xf   :  { %s18_s14 = sld [smem:[#allocation3]]  ;;  %s146_s15 = sld [smem:[#allocation3 + $0x1]]  ;;  %v223_v0 = vld [vmem:[%s316_s1] sm:$0x1]  ;;  %v232_v2 = vld [vmem:[%s316_s1 + $0x1] sm:$0x1] }
  0x10   :  { %s210_s16 = sld [smem:[#allocation3 + $0x14]]  ;;  %s148_s17 = sld [smem:[#allocation3 + $0x2]] }
  0x11   :  { %s149_s18 = sld [smem:[#allocation3 + $0x3]]  ;;  %s212_s0 = sld [smem:[#allocation3 + $0x15]] }
  0x12   :  { %s151_s19 = sld [smem:[#allocation3 + $0x4]]  ;;  %s152_s20 = sld [smem:[#allocation3 + $0x5]] }
  0x13   :  { %s214_s21 = sld [smem:[#allocation3 + $0x16]]  ;;  %s218_s23 = sld [smem:[#allocation3 + $0x7]] }
  0x14   :  { %s216_s22 = sld [smem:[#allocation3 + $0x6]]  ;;  %s225_s26 = sld [smem:[#allocation3 + $0x17]] }
  0x15   :  { %v19_v1 = vstv %s18_s14  ;;  %s227_s27 = sld [smem:[#allocation3 + $0x8]]  ;;  %v22_v4 = vstv %s146_s15  ;;  %s235_s30 = sld [smem:[#allocation3 + $0x9]] }
  0x16   :  { %v20_v3 = vmul.f32 %v19_v1, %v223_v0  ;;  %s237_s3 = sld [smem:[#allocation3 + $0x18]]  ;;  %v23_v5 = vmul.f32 %v232_v2, %v22_v4  ;;  %v30_v6 = vstv %s148_s17  ;;  %s240_s4 = sld [smem:[#allocation3 + $0xa]]  ;;  %v26_v8 = vstv %s210_s16 }
  0x17   :  { %v33_v7 = vstv %s149_s18  ;;  %s242_s5 = sld [smem:[#allocation3 + $0xb]]  ;;  %v31_v9 = vmul.f32 %v30_v6, %v223_v0  ;;  %s247_s1 = sld [smem:[#allocation3 + $0x19]]  ;;  %v37_v13 = vstv %s212_s0 }
  0x18   :  { %v34_v10 = vmul.f32 %v232_v2, %v33_v7  ;;  %v42_v11 = vstv %s151_s19  ;;  %v24_v12 = vadd.f32 %v23_v5, %v20_v3  ;;  %v45_v15 = vstv %s152_s20  ;;  %s251_s6 = sld [smem:[#allocation3 + $0xc]]  ;;  %s253_s7 = sld [smem:[#allocation3 + $0xd]] }
  0x19   :  { %v43_v14 = vmul.f32 %v42_v11, %v223_v0  ;;  %v46_v17 = vmul.f32 %v232_v2, %v45_v15  ;;  %v57_v19 = vstv %s218_s23  ;;  %s258_s8 = sld [smem:[#allocation3 + $0x1a]]  ;;  %v49_v21 = vstv %s214_s21  ;;  %s263_s9 = sld [smem:[#allocation3 + $0xe]] }
  0x1a   :  { %v35_v16 = vadd.f32 %v34_v10, %v31_v9  ;;  %v54_v18 = vstv %s216_s22  ;;  %v27_v20 = vadd.f32 %v26_v8, %v24_v12  ;;  %v58_v23 = vmul.f32 %v232_v2, %v57_v19  ;;  %s265_s10 = sld [smem:[#allocation3 + $0xf]]  ;;  %s269_s11 = sld [smem:[#allocation3 + $0x1b]] }
  0x1b   :  { %v55_v22 = vmul.f32 %v54_v18, %v223_v0  ;;  %v47_v25 = vadd.f32 %v46_v17, %v43_v14  ;;  %v66_v26 = vstv %s227_s27  ;;  %v69_v27 = vstv %s235_s30  ;;  %s274_s12 = sld [smem:[#allocation3 + $0x10]]  ;;  %s276_s13 = sld [smem:[#allocation3 + $0x11]] }
  0x1c   :  { %v38_v24 = vadd.f32 %v37_v13, %v35_v16  ;;  %v61_v29 = vstv %s225_s26  ;;  %v67_v30 = vmul.f32 %v66_v26, %v223_v0  ;;  %v70_v31 = vmul.f32 %v232_v2, %v69_v27  ;;  %s280_s14 = sld [smem:[#allocation3 + $0x1c]]  ;;  %s284_s15 = sld [smem:[#allocation3 + $0x12]] }
  0x1d   :  { %v59_v28 = vadd.f32 %v58_v23, %v55_v22  ;;  %v28_v32 = vmax.f32 %v27_v20, 0.0  ;;  %v73_v34 = vstv %s237_s3  ;;  %v77_v35 = vstv %s240_s4  ;;  %s286_s16 = sld [smem:[#allocation3 + $0x13]]  ;;  %s294_s17 = sld [smem:[#allocation3 + $0x1d]] }
  0x1e   :  { %v39_v33 = vmax.f32 %v38_v24, 0.0  ;;  %v50_v36 = vadd.f32 %v49_v21, %v47_v25  ;;  %v71_v37 = vadd.f32 %v70_v31, %v67_v30  ;;  %v78_v38 = vmul.f32 %v77_v35, %v223_v0  ;;  %s175_s18 = sld [smem:[#allocation3 + $0x1e]] }
  0x1f   :  { %v80_v39 = vstv %s242_s5  ;;  %v62_v40 = vadd.f32 %v61_v29, %v59_v28  ;;  %v84_v43 = vstv %s247_s1  ;;  %v89_v44 = vstv %s251_s6 }
  0x20   :  { %v81_v41 = vmul.f32 %v232_v2, %v80_v39  ;;  %v74_v42 = vadd.f32 %v73_v34, %v71_v37  ;;  %v92_v45 = vstv %s253_s7  ;;  %v40_v46 = vadd.f32 %v39_v33, %v28_v32 }
  0x21   :  { %v90_v48 = vmul.f32 %v89_v44, %v223_v0  ;;  %v93_v49 = vmul.f32 %v232_v2, %v92_v45  ;;  %v51_v50 = vmax.f32 %v50_v36, 0.0  ;;  %v96_v51 = vstv %s258_s8 }
  0x22   :  { %v82_v47 = vadd.f32 %v81_v41, %v78_v38  ;;  %v101_v52 = vstv %s263_s9  ;;  %v104_v53 = vstv %s265_s10  ;;  %v75_v54 = vmax.f32 %v74_v42, 0.0 }
  0x23   :  { %v94_v56 = vadd.f32 %v93_v49, %v90_v48  ;;  %v102_v57 = vmul.f32 %v101_v52, %v223_v0  ;;  %v105_v58 = vmul.f32 %v232_v2, %v104_v53  ;;  %v108_v59 = vstv %s269_s11 }
  0x24   :  { %v85_v55 = vadd.f32 %v84_v43, %v82_v47  ;;  %v113_v60 = vstv %s274_s12  ;;  %v116_v61 = vstv %s276_s13  ;;  %v120_v5 = vstv %s280_s14 }
  0x25   :  { %v97_v63 = vadd.f32 %v96_v51, %v94_v56  ;;  %v114_v1 = vmul.f32 %v113_v60, %v223_v0  ;;  %v117_v3 = vmul.f32 %v232_v2, %v116_v61  ;;  %v106_v4 = vadd.f32 %v105_v58, %v102_v57 }
  0x26   :  { %v86_v62 = vmax.f32 %v85_v55, 0.0  ;;  %v125_v6 = vstv %s284_s15  ;;  %v128_v7 = vstv %s286_s16  ;;  %v132_v16 = vstv %s294_s17 }
  0x27   :  { %v98_v9 = vmax.f32 %v97_v63, 0.0  ;;  %v118_v10 = vadd.f32 %v117_v3, %v114_v1  ;;  %v126_v11 = vmul.f32 %v125_v6, %v223_v0  ;;  %v109_v12 = vadd.f32 %v108_v59, %v106_v4 }
  0x28   :  { %v87_v8 = vadd.f32 %v86_v62, %v75_v54  ;;  %v129_v13 = vmul.f32 %v232_v2, %v128_v7  ;;  %v52_v17 = vadd.f32 %v51_v50, %v40_v46  ;;  %v63_v18 = vmax.f32 %v62_v40, 0.0 }
  0x29   :  { %v121_v15 = vadd.f32 %v120_v5, %v118_v10  ;;  %v110_v19 = vmax.f32 %v109_v12, 0.0  ;;  %v138_v28 = vstv %s175_s18 }
  0x2a   :  { %v99_v14 = vadd.f32 %v98_v9, %v87_v8  ;;  %v130_v20 = vadd.f32 %v129_v13, %v126_v11  ;;  %v64_v24 = vadd.f32 %v63_v18, %v52_v17 }
  0x2b   :  { %v122_v21 = vmax.f32 %v121_v15, 0.0 }
  0x2c   :  { %v111_v22 = vadd.f32 %v110_v19, %v99_v14  ;;  %v133_v23 = vadd.f32 %v132_v16, %v130_v20 }
  0x2e   :  { %v123_v25 = vadd.f32 %v122_v21, %v111_v22  ;;  %v134_v26 = vmax.f32 %v133_v23, 0.0 }
  0x30   :  { %v135_v27 = vadd.f32 %v134_v26, %v123_v25 }
  0x32   :  { %v137_v0 = vsub.f32 %v64_v24, %v135_v27 }
  0x34   :  { %v139_v29 = vadd.f32 %v138_v28, %v137_v0 }
  0x36   :  { %140 = vst [vmem:[%s317_s2] sm:$0x1] %v139_v29 }

</bundles_post_ra>
